<compile_context>
chip_gen: v7x
topology: tpu7x:2x2x1
jax: 0.10.0
libtpu: 0.0.40
codegen_flags: <defaults>
</compile_context>

<pallas_src>
import jax
import jax.numpy as jnp
from jax.experimental import pallas as pl
from jax.experimental.pallas import tpu as pltpu


def _round_up(x, m):
    return ((x + m - 1) // m) * m


def _make_fused_mlp_kernel(num_layers):
    """Kernel: refs = (x_ref, w0, b0, w1, b1, ..., w{L-1}, b{L-1}, o_ref)."""

    def kernel(*refs):
        x_ref = refs[0]
        o_ref = refs[-1]
        wb_refs = refs[1:-1]

        h = x_ref[...]  # [BT, Kp] bf16, resident in VMEM
        # Unrolled layer loop: activations ping-pong through VMEM/vregs only,
        # never through HBM.
        for l in range(num_layers):
            w_ref = wb_refs[2 * l]
            b_ref = wb_refs[2 * l + 1]
            # bf16 x bf16 -> f32 accumulation on the MXU.
            y = jnp.dot(h, w_ref[...], preferred_element_type=jnp.float32)
            y = y + b_ref[...]           # f32 bias add (VPU f32, v5e-safe)
            y = jnp.maximum(y, 0.0)      # act_fun = ReLU (after every layer)
            if l + 1 < num_layers:
                h = y.astype(jnp.bfloat16)   # bf16 handoff to next MXU matmul
            else:
                o_ref[...] = y.astype(o_ref.dtype)

    return kernel


@jax.jit
def rede_neurotica_forward(x, params):
    """Fused forward.  x: [B, C, H, W]; params: tuple of (w[in,out], b[out])."""
    B = x.shape[0]
    x2 = x.reshape(B, -1)                              # flatten like x.view(B, -1)
    K = x2.shape[1]
    num_layers = len(params)
    n_out = params[-1][0].shape[1]                     # true final width (2)

    # --- tiling: lane-pad features, pick a roofline-friendly batch tile ------
    Kp = _round_up(K, 128)
    Bp8 = _round_up(B, 8)
    if Bp8 <= 256:
        BT = Bp8                                       # one tile, no grid overhead
    else:
        # >= 2 tiles (v7x megacore split) of at most 512 rows each, rounded to
        # the 8-row sublane tile so batch padding stays minimal.
        n_tiles = max(2, -(-Bp8 // 512))
        BT = _round_up(-(-Bp8 // n_tiles), 8)
    Bp = _round_up(Bp8, BT)

    # bf16 operands for the MXU; pad ONLY if actually needed (K=1024 already
    # lane-aligned -> no full-copy pad op on the x stream).
    xb = x2.astype(jnp.bfloat16)
    if (Bp, Kp) != (B, K):
        xb = jnp.pad(xb, ((0, Bp - B), (0, Kp - K)))   # zero-padded rows/cols

    padded = []
    for (w, b) in params:
        kin, kout = w.shape
        kin_p = _round_up(kin, 128)
        kout_p = _round_up(kout, 128)
        wp = w.astype(jnp.bfloat16)
        if (kin_p, kout_p) != (kin, kout):
            wp = jnp.pad(wp, ((0, kin_p - kin), (0, kout_p - kout)))   # zero pad
        bp = jnp.pad(b.astype(jnp.float32),
                     (0, kout_p - kout)).reshape(1, kout_p)            # f32 bias
        padded.append((wp, bp))
    Np = padded[-1][0].shape[1]

    # --- VMEM budget: tiles double-buffered, weights resident; cap for v7x ---
    vmem_needed = 2 * (BT * Kp * 2 + BT * Np * 4)      # x (bf16) + out (f32), 2-deep
    for (wp, bp) in padded:
        vmem_needed += 2 * (wp.size * 2 + bp.size * 4)
    vmem_limit = min(max(32 * 1024 * 1024, int(vmem_needed * 2) + (4 << 20)),
                     48 * 1024 * 1024)                 # <= 48 MiB: safe on v7x 64 MiB

    # --- single fused pallas_call --------------------------------------------
    in_specs = [pl.BlockSpec((BT, Kp), lambda i: (i, 0))]       # x: tiled on batch
    flat_inputs = [xb]
    for (wp, bp) in padded:
        # Constant index_maps -> weights/biases stay resident in VMEM across
        # batch-grid iterations (no re-DMA per batch tile).
        in_specs.append(pl.BlockSpec(wp.shape, lambda i: (0, 0)))
        in_specs.append(pl.BlockSpec(bp.shape, lambda i: (0, 0)))
        flat_inputs.extend([wp, bp])

    out_p = pl.pallas_call(
        _make_fused_mlp_kernel(num_layers),
        out_shape=jax.ShapeDtypeStruct((Bp, Np), jnp.float32),
        grid=(Bp // BT,),
        in_specs=in_specs,
        out_specs=pl.BlockSpec((BT, Np), lambda i: (i, 0)),     # lane-dense stores
        compiler_params=pltpu.CompilerParams(
            dimension_semantics=("parallel",),          # batch tiles split across TCs
            vmem_limit_bytes=vmem_limit,
        ),
    )(*flat_inputs)

    # Slice off batch padding and zero-padded output lanes.
    return out_p[:B, :n_out]


def init_params(key, input_size, hidden_size, num_hidden_layers):
    """Layers: [in->hidden], (num_hidden_layers-1) x [hidden->hidden], [hidden->2].
    Weights stored as [in, out] (transpose of nn.Linear)."""
    dims = [input_size] + [hidden_size] * num_hidden_layers + [2]
    params = []
    for i in range(len(dims) - 1):
        key, k_w, k_b = jax.random.split(key, 3)
        fan_in = dims[i]
        bound = 1.0 / (fan_in ** 0.5)   # PyTorch nn.Linear default uniform bound
        w = jax.random.uniform(k_w, (dims[i], dims[i + 1]), jnp.float32,
                               minval=-bound, maxval=bound)
        b = jax.random.uniform(k_b, (dims[i + 1],), jnp.float32,
                               minval=-bound, maxval=bound)
        params.append((w, b))
    return tuple(params)


def _reference_forward(x, params):
    """Pure-JAX reference matching the kernel's numerics (bf16 operands,
    f32 accumulation, bf16 inter-layer handoff, ReLU after every layer)."""
    h = x.reshape(x.shape[0], -1).astype(jnp.bfloat16).astype(jnp.float32)
    num_layers = len(params)
    for l, (w, b) in enumerate(params):
        wl = w.astype(jnp.bfloat16).astype(jnp.float32)
        y = jnp.dot(h, wl, precision=jax.lax.Precision.HIGHEST) + b
        y = jnp.maximum(y, 0.0)
        if l + 1 < num_layers:
            h = y.astype(jnp.bfloat16).astype(jnp.float32)
        else:
            h = y
    return h


if __name__ == "__main__":
    key = jax.random.PRNGKey(0)
    k_x, k_p = jax.random.split(key)

    # Small shapes consistent with the module: batch=2, channels=4, spatial=16.
    B, C, H, W = 2, 4, 16, 16
    input_size = C * H * W          # 1024 (flatten dimension)
    hidden_size = 32
    num_hidden_layers = 2

    x = jax.random.normal(k_x, (B, C, H, W), jnp.float32)
    params = init_params(k_p, input_size, hidden_size, num_hidden_layers)

    out = rede_neurotica_forward(x, params)
    out = jax.block_until_ready(out)

    # Sanity check vs matched-precision pure-JAX reference.
    ref = _reference_forward(x, params)
    assert out.shape == (B, 2), out.shape
    assert jnp.allclose(out, ref, atol=1e-4, rtol=1e-4), "mismatch vs reference"

    print("KERNEL_OK")
</pallas_src>

<mosaic_0001>
module attributes {stable_mosaic.version = 11 : i64} {
  func.func @kernel(%arg0: i32, %arg1: memref<8x1024xbf16, #tpu.memory_space<vmem>>, %arg2: memref<1024x128xbf16, #tpu.memory_space<vmem>>, %arg3: memref<1x128xf32, #tpu.memory_space<vmem>>, %arg4: memref<128x128xbf16, #tpu.memory_space<vmem>>, %arg5: memref<1x128xf32, #tpu.memory_space<vmem>>, %arg6: memref<128x128xbf16, #tpu.memory_space<vmem>>, %arg7: memref<1x128xf32, #tpu.memory_space<vmem>>, %arg8: memref<8x128xf32, #tpu.memory_space<vmem>>) attributes {dimension_semantics = [#tpu.dimension_semantics<parallel>], iteration_bounds = array<i64: 1>, scalar_prefetch = 0 : i64, scratch_operands = 0 : i64, tpu.core_type = #tpu.core_type<tc>, window_params = [{transform_indices = @transform_0, window_bounds = array<i64: 8, 1024>}, {pipeline_mode = #tpu.pipeline_mode<synchronous>, transform_indices = @transform_1, window_bounds = array<i64: 1024, 128>}, {pipeline_mode = #tpu.pipeline_mode<synchronous>, transform_indices = @transform_2, window_bounds = array<i64: 1, 128>}, {pipeline_mode = #tpu.pipeline_mode<synchronous>, transform_indices = @transform_3, window_bounds = array<i64: 128, 128>}, {pipeline_mode = #tpu.pipeline_mode<synchronous>, transform_indices = @transform_4, window_bounds = array<i64: 1, 128>}, {pipeline_mode = #tpu.pipeline_mode<synchronous>, transform_indices = @transform_5, window_bounds = array<i64: 128, 128>}, {pipeline_mode = #tpu.pipeline_mode<synchronous>, transform_indices = @transform_6, window_bounds = array<i64: 1, 128>}, {transform_indices = @transform_7, window_bounds = array<i64: 8, 128>}]} {
    %c0 = arith.constant 0 : index
    %c0_0 = arith.constant 0 : index
    %0 = vector.load %arg1[%c0, %c0_0] : memref<8x1024xbf16, #tpu.memory_space<vmem>>, vector<8x1024xbf16>
    %c0_1 = arith.constant 0 : index
    %c0_2 = arith.constant 0 : index
    %1 = vector.load %arg2[%c0_1, %c0_2] : memref<1024x128xbf16, #tpu.memory_space<vmem>>, vector<1024x128xbf16>
    %cst = arith.constant dense<0.000000e+00> : vector<8x128xf32>
    %2 = tpu.matmul %0, %1, %cst {dimension_numbers = #tpu.dot_dimension_numbers<[1], [0], [0], [1], [0, 0, 1, 1], [], []>} : vector<8x1024xbf16>, vector<1024x128xbf16>, vector<8x128xf32> -> vector<8x128xf32>
    %c0_3 = arith.constant 0 : index
    %c0_4 = arith.constant 0 : index
    %3 = vector.load %arg3[%c0_3, %c0_4] : memref<1x128xf32, #tpu.memory_space<vmem>>, vector<1x128xf32>
    %4 = vector.broadcast %3 : vector<1x128xf32> to vector<8x128xf32>
    %5 = arith.addf %2, %4 : vector<8x128xf32>
    %cst_5 = arith.constant 0.000000e+00 : f32
    %6 = vector.broadcast %cst_5 : f32 to vector<8x128xf32>
    %7 = arith.maximumf %5, %6 : vector<8x128xf32>
    %8 = arith.truncf %7 : vector<8x128xf32> to vector<8x128xbf16>
    %c0_6 = arith.constant 0 : index
    %c0_7 = arith.constant 0 : index
    %9 = vector.load %arg4[%c0_6, %c0_7] : memref<128x128xbf16, #tpu.memory_space<vmem>>, vector<128x128xbf16>
    %cst_8 = arith.constant dense<0.000000e+00> : vector<8x128xf32>
    %10 = tpu.matmul %8, %9, %cst_8 {dimension_numbers = #tpu.dot_dimension_numbers<[1], [0], [0], [1], [0, 0, 1, 1], [], []>} : vector<8x128xbf16>, vector<128x128xbf16>, vector<8x128xf32> -> vector<8x128xf32>
    %c0_9 = arith.constant 0 : index
    %c0_10 = arith.constant 0 : index
    %11 = vector.load %arg5[%c0_9, %c0_10] : memref<1x128xf32, #tpu.memory_space<vmem>>, vector<1x128xf32>
    %12 = vector.broadcast %11 : vector<1x128xf32> to vector<8x128xf32>
    %13 = arith.addf %10, %12 : vector<8x128xf32>
    %cst_11 = arith.constant 0.000000e+00 : f32
    %14 = vector.broadcast %cst_11 : f32 to vector<8x128xf32>
    %15 = arith.maximumf %13, %14 : vector<8x128xf32>
    %16 = arith.truncf %15 : vector<8x128xf32> to vector<8x128xbf16>
    %c0_12 = arith.constant 0 : index
    %c0_13 = arith.constant 0 : index
    %17 = vector.load %arg6[%c0_12, %c0_13] : memref<128x128xbf16, #tpu.memory_space<vmem>>, vector<128x128xbf16>
    %cst_14 = arith.constant dense<0.000000e+00> : vector<8x128xf32>
    %18 = tpu.matmul %16, %17, %cst_14 {dimension_numbers = #tpu.dot_dimension_numbers<[1], [0], [0], [1], [0, 0, 1, 1], [], []>} : vector<8x128xbf16>, vector<128x128xbf16>, vector<8x128xf32> -> vector<8x128xf32>
    %c0_15 = arith.constant 0 : index
    %c0_16 = arith.constant 0 : index
    %19 = vector.load %arg7[%c0_15, %c0_16] : memref<1x128xf32, #tpu.memory_space<vmem>>, vector<1x128xf32>
    %20 = vector.broadcast %19 : vector<1x128xf32> to vector<8x128xf32>
    %21 = arith.addf %18, %20 : vector<8x128xf32>
    %cst_17 = arith.constant 0.000000e+00 : f32
    %22 = vector.broadcast %cst_17 : f32 to vector<8x128xf32>
    %23 = arith.maximumf %21, %22 : vector<8x128xf32>
    %c0_18 = arith.constant 0 : index
    %c0_19 = arith.constant 0 : index
    %24 = vector.load %arg8[%c0_18, %c0_19] : memref<8x128xf32, #tpu.memory_space<vmem>>, vector<8x128xf32>
    tpu.vector_store %arg8[%c0_18, %c0_19], %23 {strides = array<i32>} : memref<8x128xf32, #tpu.memory_space<vmem>>, vector<8x128xf32>,
    return
  }
  func.func @transform_0(%arg0: i32) -> (i32, i32) {
    %c0_i32 = arith.constant 0 : i32
    %c0_i32_0 = arith.constant 0 : i32
    return %arg0, %c0_i32 : i32, i32
  }
  func.func @transform_1(%arg0: i32) -> (i32, i32) {
    %c0_i32 = arith.constant 0 : i32
    %c0_i32_0 = arith.constant 0 : i32
    %c0_i32_1 = arith.constant 0 : i32
    return %c0_i32, %c0_i32_0 : i32, i32
  }
  func.func @transform_2(%arg0: i32) -> (i32, i32) {
    %c0_i32 = arith.constant 0 : i32
    %c0_i32_0 = arith.constant 0 : i32
    %c0_i32_1 = arith.constant 0 : i32
    return %c0_i32, %c0_i32_0 : i32, i32
  }
  func.func @transform_3(%arg0: i32) -> (i32, i32) {
    %c0_i32 = arith.constant 0 : i32
    %c0_i32_0 = arith.constant 0 : i32
    %c0_i32_1 = arith.constant 0 : i32
    return %c0_i32, %c0_i32_0 : i32, i32
  }
  func.func @transform_4(%arg0: i32) -> (i32, i32) {
    %c0_i32 = arith.constant 0 : i32
    %c0_i32_0 = arith.constant 0 : i32
    %c0_i32_1 = arith.constant 0 : i32
    return %c0_i32, %c0_i32_0 : i32, i32
  }
  func.func @transform_5(%arg0: i32) -> (i32, i32) {
    %c0_i32 = arith.constant 0 : i32
    %c0_i32_0 = arith.constant 0 : i32
    %c0_i32_1 = arith.constant 0 : i32
    return %c0_i32, %c0_i32_0 : i32, i32
  }
  func.func @transform_6(%arg0: i32) -> (i32, i32) {
    %c0_i32 = arith.constant 0 : i32
    %c0_i32_0 = arith.constant 0 : i32
    %c0_i32_1 = arith.constant 0 : i32
    return %c0_i32, %c0_i32_0 : i32, i32
  }
  func.func @transform_7(%arg0: i32) -> (i32, i32) {
    %c0_i32 = arith.constant 0 : i32
    %c0_i32_0 = arith.constant 0 : i32
    return %arg0, %c0_i32 : i32, i32
  }
}

</mosaic_0001>

<bundles_post_ra>
// kernel: rede_neurotica_forward.1
= control target key start
LH: loop header
LB: loop body
LE: loop exit
PB: predicated region body
PF: predicated region fallthrough
CT: control target
= control target key end

     0   :  { %vm1298_vm0 = vmmov 0   ;;  %s1621_s1 = inlined_call_operand.vmem [shape: bf16[1024,128], index: 1, kind: input, shape index: {}]   ;;  %s1622_s0 = inlined_call_operand.vmem [shape: bf16[8,1024], index: 0, kind: input, shape index: {}]   ;;  %s1623_s3 = inlined_call_operand.vmem [shape: bf16[128,128], index: 3, kind: input, shape index: {}]   ;;  %s1624_s5 = inlined_call_operand.vmem [shape: bf16[128,128], index: 5, kind: input, shape index: {}]   ;;  %s1625_s2 = inlined_call_operand.vmem [shape: f32[1,128], index: 2, kind: input, shape index: {}]   ;;  %s1626_s4 = inlined_call_operand.vmem [shape: f32[1,128], index: 4, kind: input, shape index: {}]   ;;  %s1627_s6 = inlined_call_operand.vmem [shape: f32[1,128], index: 6, kind: input, shape index: {}]   ;;  %s1628_s7 = inlined_call_operand.vmem [shape: f32[8,128], index: 7, kind: output, shape index: {}]  }
   0x1   :  { %v1209_v0 = vld [vmem:[%s1621_s1 + $0x40] sm:$0xff]   ;;  %v1213_v4 = vld [vmem:[%s1621_s1 + $0x48] sm:$0xff]   ;;  %v1217_v8 = vld [vmem:[%s1621_s1 + $0x50] sm:$0xff]  }
   0x2   :  { %v1210_v1 = vld [vmem:[%s1621_s1 + $0xc0] sm:$0xff]   ;;  %1061 = vmatprep.subr.bf16.mxu0 %v1209_v0  ;;  %v1214_v5 = vld [vmem:[%s1621_s1 + $0xc8] sm:$0xff]   ;;  %v1218_v9 = vld [vmem:[%s1621_s1 + $0xd0] sm:$0xff]  }
   0x3   :  { %v1211_v2 = vld [vmem:[%s1621_s1] sm:$0xff]   ;;  %1083 = vmatprep.subr.bf16.mxu1 %v1210_v1  ;;  %v1215_v6 = vld [vmem:[%s1621_s1 + $0x8] sm:$0xff]   ;;  %v1219_v10 = vld [vmem:[%s1621_s1 + $0x10] sm:$0xff]  }
   0x4   :  { %v1212_v3 = vld [vmem:[%s1621_s1 + $0x80] sm:$0xff]   ;;  %1062 = vmatpush3.bf16.msra.mxu0 %v1211_v2  ;;  %v1216_v7 = vld [vmem:[%s1621_s1 + $0x88] sm:$0xff]   ;;  %v1220_v11 = vld [vmem:[%s1621_s1 + $0x90] sm:$0xff]  }
   0x5   :  { %1084 = vmatpush3.bf16.msra.mxu1 %v1212_v3  ;;  %1063 = vmatprep.subr.bf16.mxu0 %v1213_v4  ;;  %v1221_v12 = vld [vmem:[%s1621_s1 + $0x58] sm:$0xff]   ;;  %v1225_v16 = vld [vmem:[%s1621_s1 + $0x60] sm:$0xff]   ;;  %v1229_v20 = vld [vmem:[%s1621_s1 + $0x68] sm:$0xff]  }
   0x6   :  { %1085 = vmatprep.subr.bf16.mxu1 %v1214_v5  ;;  %v1222_v13 = vld [vmem:[%s1621_s1 + $0xd8] sm:$0xff]   ;;  %v1226_v17 = vld [vmem:[%s1621_s1 + $0xe0] sm:$0xff]   ;;  %v1230_v21 = vld [vmem:[%s1621_s1 + $0xe8] sm:$0xff]  }
   0x7   :  { %v1223_v14 = vld [vmem:[%s1621_s1 + $0x18] sm:$0xff]   ;;  %v1227_v18 = vld [vmem:[%s1621_s1 + $0x20] sm:$0xff]   ;;  %v1231_v22 = vld [vmem:[%s1621_s1 + $0x28] sm:$0xff]  }
   0x8   :  { %1064 = vmatpush3.bf16.msra.mxu0 %v1215_v6  ;;  %v1224_v15 = vld [vmem:[%s1621_s1 + $0x98] sm:$0xff]   ;;  %v1228_v19 = vld [vmem:[%s1621_s1 + $0xa0] sm:$0xff]   ;;  %v1232_v23 = vld [vmem:[%s1621_s1 + $0xa8] sm:$0xff]  }
   0x9   :  { %1086 = vmatpush3.bf16.msra.mxu1 %v1216_v7  ;;  %1065 = vmatprep.subr.bf16.mxu0 %v1217_v8  ;;  %v1233_v24 = vld [vmem:[%s1621_s1 + $0x70] sm:$0xff]   ;;  %v1237_v28 = vld [vmem:[%s1621_s1 + $0x78] sm:$0xff]   ;;  %v27_v32 = vld [vmem:[%s1622_s0] sm:$0xff] }
   0xa   :  { %1087 = vmatprep.subr.bf16.mxu1 %v1218_v9  ;;  %v1234_v25 = vld [vmem:[%s1621_s1 + $0xf0] sm:$0xff]   ;;  %v1238_v29 = vld [vmem:[%s1621_s1 + $0xf8] sm:$0xff]   ;;  %v28_v33 = vld [vmem:[%s1622_s0 + $0x8] sm:$0xff]  ;;  %v971_v34 = vcombine.low %v27_v32, %v27_v32  ;;  %v972_v35 = vcombine.high %v27_v32, %v27_v32 }
   0xb   :  { %v1235_v26 = vld [vmem:[%s1621_s1 + $0x30] sm:$0xff]   ;;  %v1239_v30 = vld [vmem:[%s1621_s1 + $0x38] sm:$0xff]   ;;  %v973_v36 = vcombine.low %v28_v33, %v28_v33  ;;  %v974_v37 = vcombine.high %v28_v33, %v28_v33  ;;  %v1245_v38 = vld [vmem:[%s1621_s1 + $0x140] sm:$0xff]  }
   0xc   :  { %1066 = vmatpush3.bf16.msra.mxu0 %v1219_v10  ;;  %v1236_v27 = vld [vmem:[%s1621_s1 + $0xb0] sm:$0xff]   ;;  %v1240_v31 = vld [vmem:[%s1621_s1 + $0xb8] sm:$0xff]   ;;  %v1246_v39 = vld [vmem:[%s1621_s1 + $0x1c0] sm:$0xff]   ;;  %610 = vmatprep.mubr.bf16.mxu0 %v972_v35 }
   0xd   :  { %1088 = vmatpush3.bf16.msra.mxu1 %v1220_v11  ;;  %1067 = vmatprep.subr.bf16.mxu0 %v1221_v12  ;;  %v1247_v40 = vld [vmem:[%s1621_s1 + $0x100] sm:$0xff]   ;;  %v1249_v42 = vld [vmem:[%s1621_s1 + $0x148] sm:$0xff]   ;;  %v1253_v46 = vld [vmem:[%s1621_s1 + $0x150] sm:$0xff]   ;;  %v1297_v12 = vmov 0.0  }
   0xe   :  { %1089 = vmatprep.subr.bf16.mxu1 %v1222_v13  ;;  %650 = vmatprep.mubr.bf16.mxu1 %v974_v37  ;;  %v1248_v41 = vld [vmem:[%s1621_s1 + $0x180] sm:$0xff]   ;;  %v1250_v43 = vld [vmem:[%s1621_s1 + $0x1c8] sm:$0xff]   ;;  %v1254_v47 = vld [vmem:[%s1621_s1 + $0x1d0] sm:$0xff]  }
   0xf   :  { %v1251_v44 = vld [vmem:[%s1621_s1 + $0x108] sm:$0xff]   ;;  %v1255_v48 = vld [vmem:[%s1621_s1 + $0x110] sm:$0xff]   ;;  %v1257_v50 = vld [vmem:[%s1621_s1 + $0x158] sm:$0xff]  }
  0x10   :  { %1068 = vmatpush3.bf16.msra.mxu0 %v1223_v14  ;;  %v1252_v45 = vld [vmem:[%s1621_s1 + $0x188] sm:$0xff]   ;;  %v1256_v49 = vld [vmem:[%s1621_s1 + $0x190] sm:$0xff]   ;;  %v1258_v51 = vld [vmem:[%s1621_s1 + $0x1d8] sm:$0xff]  }
  0x11   :  { %1090 = vmatpush3.bf16.msra.mxu1 %v1224_v15  ;;  %1069 = vmatprep.subr.bf16.mxu0 %v1225_v16  ;;  %v1259_v52 = vld [vmem:[%s1621_s1 + $0x118] sm:$0xff]   ;;  %v1261_v54 = vld [vmem:[%s1621_s1 + $0x160] sm:$0xff]   ;;  %v1265_v58 = vld [vmem:[%s1621_s1 + $0x168] sm:$0xff]  }
  0x12   :  { %1091 = vmatprep.subr.bf16.mxu1 %v1226_v17  ;;  %v1260_v53 = vld [vmem:[%s1621_s1 + $0x198] sm:$0xff]   ;;  %v1262_v55 = vld [vmem:[%s1621_s1 + $0x1e0] sm:$0xff]   ;;  %v1266_v59 = vld [vmem:[%s1621_s1 + $0x1e8] sm:$0xff]  }
  0x13   :  { %v1263_v56 = vld [vmem:[%s1621_s1 + $0x120] sm:$0xff]   ;;  %v1267_v60 = vld [vmem:[%s1621_s1 + $0x128] sm:$0xff]   ;;  %v1269_v62 = vld [vmem:[%s1621_s1 + $0x170] sm:$0xff]  }
  0x14   :  { %1070 = vmatpush3.bf16.msra.mxu0 %v1227_v18  ;;  %v1264_v57 = vld [vmem:[%s1621_s1 + $0x1a0] sm:$0xff]   ;;  %v1268_v61 = vld [vmem:[%s1621_s1 + $0x1a8] sm:$0xff]   ;;  %v1270_v63 = vld [vmem:[%s1621_s1 + $0x1f0] sm:$0xff]  }
  0x15   :  { %1092 = vmatpush3.bf16.msra.mxu1 %v1228_v19  ;;  %1071 = vmatprep.subr.bf16.mxu0 %v1229_v20  ;;  %v1271_v0 = vld [vmem:[%s1621_s1 + $0x130] sm:$0xff]   ;;  %v1273_v2 = vld [vmem:[%s1621_s1 + $0x178] sm:$0xff]   ;;  %v1281_v13 = vld [vmem:[%s1623_s3] sm:$0xff]  }
  0x16   :  { %1093 = vmatprep.subr.bf16.mxu1 %v1230_v21  ;;  %v1272_v1 = vld [vmem:[%s1621_s1 + $0x1b0] sm:$0xff]   ;;  %v1274_v3 = vld [vmem:[%s1621_s1 + $0x1f8] sm:$0xff]   ;;  %v1282_v14 = vld [vmem:[%s1623_s3 + $0x8] sm:$0xff]  }
  0x17   :  { %v1275_v4 = vld [vmem:[%s1621_s1 + $0x138] sm:$0xff]   ;;  %v29_v6 = vld [vmem:[%s1622_s0 + $0x10] sm:$0xff]  ;;  %v1285_v17 = vld [vmem:[%s1623_s3 + $0x20] sm:$0xff]  }
  0x18   :  { %1072 = vmatpush3.bf16.msra.mxu0 %v1231_v22  ;;  %v1276_v5 = vld [vmem:[%s1621_s1 + $0x1b8] sm:$0xff]   ;;  %v975_v7 = vcombine.low %v29_v6, %v29_v6  ;;  %v976_v8 = vcombine.high %v29_v6, %v29_v6  ;;  %v1283_v15 = vld [vmem:[%s1623_s3 + $0x10] sm:$0xff]   ;;  %v1286_v18 = vld [vmem:[%s1623_s3 + $0x28] sm:$0xff]  }
  0x19   :  { %1094 = vmatpush3.bf16.msra.mxu1 %v1232_v23  ;;  %1073 = vmatprep.subr.bf16.mxu0 %v1233_v24  ;;  %v30_v9 = vld [vmem:[%s1622_s0 + $0x18] sm:$0xff]  ;;  %v1287_v19 = vld [vmem:[%s1623_s3 + $0x30] sm:$0xff]   ;;  %v1289_v21 = vld [vmem:[%s1624_s5] sm:$0xff]  }
  0x1a   :  { %1095 = vmatprep.subr.bf16.mxu1 %v1234_v25  ;;  %v977_v10 = vcombine.low %v30_v9, %v30_v9  ;;  %v978_v11 = vcombine.high %v30_v9, %v30_v9  ;;  %v1284_v16 = vld [vmem:[%s1623_s3 + $0x18] sm:$0xff]   ;;  %v1290_v22 = vld [vmem:[%s1624_s5 + $0x8] sm:$0xff]   ;;  %v1291_v23 = vld [vmem:[%s1624_s5 + $0x10] sm:$0xff]  }
  0x1b   :  { %v1288_v20 = vld [vmem:[%s1623_s3 + $0x38] sm:$0xff]   ;;  %v1293_v25 = vld [vmem:[%s1624_s5 + $0x20] sm:$0xff]  }
  0x1c   :  { %1074 = vmatpush3.bf16.msra.mxu0 %v1235_v26  ;;  %v1292_v24 = vld [vmem:[%s1624_s5 + $0x18] sm:$0xff]   ;;  %v1294_v26 = vld [vmem:[%s1624_s5 + $0x28] sm:$0xff]  }
  0x1d   :  { %1096 = vmatpush3.bf16.msra.mxu1 %v1236_v27  ;;  %1075 = vmatprep.subr.bf16.mxu0 %v1237_v28 }
  0x1e   :  { %1097 = vmatprep.subr.bf16.mxu1 %v1238_v29  ;;  %v970_v29 = vld [vmem:[%s1625_s2] ss:$0 sm:$0xff] }
  0x20   :  { %1076 = vmatpush3.bf16.msra.mxu0 %v1239_v30 }
  0x21   :  { %1098 = vmatpush3.bf16.msra.mxu1 %v1240_v31  ;;  %1105 = vmatprep.subr.bf16.mxu0 %v1245_v38 }
  0x22   :  { %1127 = vmatprep.subr.bf16.mxu1 %v1246_v39 }
  0x23   :  { %611 = vmatmul.mubr.bf16.vlgmr.msra.gmra.mrb[0].mxu0 %v971_v34 }
  0x24   :  { %651 = vmatmul.mubr.bf16.vlgmr.msra.gmra.mrb[0].mxu1 %v973_v36  ;;  %1106 = vmatpush3.bf16.msra.mxu0 %v1247_v40 }
  0x25   :  { %1128 = vmatpush3.bf16.msra.mxu1 %v1248_v41  ;;  %1107 = vmatprep.subr.bf16.mxu0 %v1249_v42 }
  0x26   :  { %1129 = vmatprep.subr.bf16.mxu1 %v1250_v43  ;;  %690 = vmatprep.mubr.bf16.mxu0 %v976_v8 }
  0x27   :  { %730 = vmatprep.mubr.bf16.mxu1 %v978_v11 }
  0x28   :  { %1108 = vmatpush3.bf16.msra.mxu0 %v1251_v44 }
  0x29   :  { %1130 = vmatpush3.bf16.msra.mxu1 %v1252_v45  ;;  %1109 = vmatprep.subr.bf16.mxu0 %v1253_v46 }
  0x2a   :  { %1131 = vmatprep.subr.bf16.mxu1 %v1254_v47 }
  0x2c   :  { %1110 = vmatpush3.bf16.msra.mxu0 %v1255_v48 }
  0x2d   :  { %1132 = vmatpush3.bf16.msra.mxu1 %v1256_v49  ;;  %1111 = vmatprep.subr.bf16.mxu0 %v1257_v50 }
  0x2e   :  { %1133 = vmatprep.subr.bf16.mxu1 %v1258_v51 }
  0x30   :  { %1112 = vmatpush3.bf16.msra.mxu0 %v1259_v52 }
  0x31   :  { %1134 = vmatpush3.bf16.msra.mxu1 %v1260_v53  ;;  %1113 = vmatprep.subr.bf16.mxu0 %v1261_v54  ;;  %v1295_v54 = vld [vmem:[%s1624_s5 + $0x30] sm:$0xff]  }
  0x32   :  { %1135 = vmatprep.subr.bf16.mxu1 %v1262_v55  ;;  %v1296_v55 = vld [vmem:[%s1624_s5 + $0x38] sm:$0xff]  }
  0x34   :  { %1114 = vmatpush3.bf16.msra.mxu0 %v1263_v56  ;;  %v1043_v56 = vld [vmem:[%s1626_s4] ss:$0 sm:$0xff] }
  0x35   :  { %1136 = vmatpush3.bf16.msra.mxu1 %v1264_v57  ;;  %1115 = vmatprep.subr.bf16.mxu0 %v1265_v58 }
  0x36   :  { %1137 = vmatprep.subr.bf16.mxu1 %v1266_v59 }
  0x38   :  { %1116 = vmatpush3.bf16.msra.mxu0 %v1267_v60 }
  0x39   :  { %1138 = vmatpush3.bf16.msra.mxu1 %v1268_v61  ;;  %1117 = vmatprep.subr.bf16.mxu0 %v1269_v62 }
  0x3a   :  { %1139 = vmatprep.subr.bf16.mxu1 %v1270_v63 }
  0x3c   :  { %1118 = vmatpush3.bf16.msra.mxu0 %v1271_v0  ;;  %v1052_v0 = vld [vmem:[%s1627_s6] ss:$0 sm:$0xff] }
  0x3d   :  { %1140 = vmatpush3.bf16.msra.mxu1 %v1272_v1  ;;  %1119 = vmatprep.subr.bf16.mxu0 %v1273_v2 }
  0x3e   :  { %1141 = vmatprep.subr.bf16.mxu1 %v1274_v3 }
  0x40   :  { %1120 = vmatpush3.bf16.msra.mxu0 %v1275_v4 }
  0x41   :  { %1142 = vmatpush3.bf16.msra.mxu1 %v1276_v5  ;;  %1167 = vmatprep.subr.bf16.mxu0 %v1297_v12 }
  0x42   :  { %1187 = vmatprep.subr.bf16.mxu1 %v1297_v12 }
  0x43   :  { %691 = vmatmul.mubr.bf16.vlgmr.msra.gmra.mrb[4].mxu0 %v975_v7 }
  0x44   :  { %731 = vmatmul.mubr.bf16.vlgmr.msra.gmra.mrb[4].mxu1 %v977_v10  ;;  %1168 = vmatpush3.bf16.msra.mxu0 %v1281_v13 }
  0x45   :  { %1169 = vmatprep.subr.bf16.mxu0 %v1297_v12  ;;  %1183 = vmatprep.mubr.msk.bf16.mxu0 %vm1298_vm0, %v1297_v12 }
  0x46   :  { %1203 = vmatprep.mubr.msk.bf16.mxu1 %vm1298_vm0, %v1297_v12  ;;  %1188 = vmatpush3.bf16.msra.mxu1 %v1289_v21 }
  0x47   :  { %1189 = vmatprep.subr.bf16.mxu1 %v1297_v12 }
  0x48   :  { %1170 = vmatpush3.bf16.msra.mxu0 %v1282_v14 }
  0x49   :  { %1171 = vmatprep.subr.bf16.mxu0 %v1297_v12 }
  0x4a   :  { %1190 = vmatpush3.bf16.msra.mxu1 %v1290_v22 }
  0x4b   :  { %1191 = vmatprep.subr.bf16.mxu1 %v1297_v12 }
  0x4c   :  { %1172 = vmatpush3.bf16.msra.mxu0 %v1283_v15 }
  0x4d   :  { %1173 = vmatprep.subr.bf16.mxu0 %v1297_v12 }
  0x4e   :  { %1192 = vmatpush3.bf16.msra.mxu1 %v1291_v23 }
  0x4f   :  { %1193 = vmatprep.subr.bf16.mxu1 %v1297_v12 }
  0x50   :  { %1174 = vmatpush3.bf16.msra.mxu0 %v1284_v16 }
  0x51   :  { %1175 = vmatprep.subr.bf16.mxu0 %v1297_v12 }
  0x52   :  { %1194 = vmatpush3.bf16.msra.mxu1 %v1292_v24 }
  0x53   :  { %1195 = vmatprep.subr.bf16.mxu1 %v1297_v12 }
  0x54   :  { %1176 = vmatpush3.bf16.msra.mxu0 %v1285_v17 }
  0x55   :  { %1177 = vmatprep.subr.bf16.mxu0 %v1297_v12 }
  0x56   :  { %1196 = vmatpush3.bf16.msra.mxu1 %v1293_v25 }
  0x57   :  { %1197 = vmatprep.subr.bf16.mxu1 %v1297_v12 }
  0x58   :  { %1178 = vmatpush3.bf16.msra.mxu0 %v1286_v18 }
  0x59   :  { %1179 = vmatprep.subr.bf16.mxu0 %v1297_v12 }
  0x5a   :  { %1198 = vmatpush3.bf16.msra.mxu1 %v1294_v26 }
  0x5b   :  { %1199 = vmatprep.subr.bf16.mxu1 %v1297_v12 }
  0x5c   :  { %1180 = vmatpush3.bf16.msra.mxu0 %v1287_v19 }
  0x5d   :  { %1181 = vmatprep.subr.bf16.mxu0 %v1297_v12 }
  0x5e   :  { %1200 = vmatpush3.bf16.msra.mxu1 %v1295_v54 }
  0x5f   :  { %1201 = vmatprep.subr.bf16.mxu1 %v1297_v12 }
  0x60   :  { %1182 = vmatpush3.bf16.msra.mxu0 %v1288_v20 }
  0x62   :  { %1202 = vmatpush3.bf16.msra.mxu1 %v1296_v55 }
  0xf6   :  { %v1077_v27 = vpop.f32.mrb[0].mxu0 }
  0xf7   :  { %v1099_v28 = vpop.f32.mrb[0].mxu1  ;;  %v1078_v30 = vpop.f32.mrb[1].mxu0 }
  0xf8   :  { %v1100_v31 = vpop.f32.mrb[1].mxu1  ;;  %v1079_v32 = vadd.f32 %v1078_v30, %v1077_v27  ;;  %v1080_v34 = vpop.f32.mrb[2].mxu0 }
  0xf9   :  { %v1101_v33 = vadd.f32 %v1100_v31, %v1099_v28  ;;  %v1102_v35 = vpop.f32.mrb[2].mxu1  ;;  %v1081_v36 = vpop.f32.mrb[3].mxu0 }
  0xfa   :  { %v1103_v37 = vpop.f32.mrb[3].mxu1  ;;  %v613_v38 = vadd.f32 %v1079_v32, %v970_v29 }
  0xfc   :  { %v653_v39 = vadd.f32 %v1101_v33, %v613_v38 }
 0x116   :  { %v1121_v40 = vpop.f32.mrb[4].mxu0 }
 0x117   :  { %v1143_v41 = vpop.f32.mrb[4].mxu1  ;;  %v1122_v42 = vpop.f32.mrb[5].mxu0 }
 0x118   :  { %v1144_v43 = vpop.f32.mrb[5].mxu1  ;;  %v1123_v44 = vadd.f32 %v1122_v42, %v1121_v40  ;;  %v1124_v46 = vpop.f32.mrb[6].mxu0 }
 0x119   :  { %v1145_v45 = vadd.f32 %v1144_v43, %v1143_v41  ;;  %v1146_v47 = vpop.f32.mrb[6].mxu1  ;;  %v1125_v48 = vpop.f32.mrb[7].mxu0 }
 0x11a   :  { %v1147_v49 = vpop.f32.mrb[7].mxu1  ;;  %v693_v50 = vadd.f32 %v1123_v44, %v653_v39 }
 0x11c   :  { %v733_v51 = vadd.f32 %v1145_v45, %v693_v50 }
 0x11e   :  { %v738_v52 = vmax.f32 %v733_v51, 0.0 }
 0x120   :  { %v739_v53 = vpack.c.bf16 %v738_v52, %v738_v52 }
 0x122   :  { %1184 = vmatmul.mubr.bf16.vlgmr.msra.gmra.mrb[8].mxu0 %v739_v53 }
 0x1f5   :  { %v845_v57 = vpop.f32.mrb[8].mxu0 }
 0x1f6   :  { %v846_v58 = vadd.f32 %v1043_v56, %v845_v57  ;;  %v1185_v59 = vpop.f32.mrb[9].mxu0 }
 0x1f7   :  { %v848_v60 = vpop.f32.mrb[10].mxu0 }
 0x1f8   :  { %v851_v61 = vmax.f32 %v846_v58, 0.0  ;;  %v1186_v62 = vpop.f32.mrb[11].mxu0 }
 0x1fa   :  { %v852_v63 = vpack.c.bf16 %v851_v61, %v851_v61 }
 0x1fc   :  { %1204 = vmatmul.mubr.bf16.vlgmr.msra.gmra.mrb[8].mxu1 %v852_v63 }
 0x2cf   :  { %v958_v1 = vpop.f32.mrb[8].mxu1 }
 0x2d0   :  { %v959_v2 = vadd.f32 %v1052_v0, %v958_v1  ;;  %v1205_v3 = vpop.f32.mrb[9].mxu1 }
 0x2d1   :  { %v961_v4 = vpop.f32.mrb[10].mxu1 }
 0x2d2   :  { %v964_v5 = vmax.f32 %v959_v2, 0.0  ;;  %v1206_v6 = vpop.f32.mrb[11].mxu1 }
 0x2d4   :  { %965 = vst [vmem:[%s1628_s7] sm:$0xff] %v964_v5 }

</bundles_post_ra>
